<compile_context>
chip_gen: v7x
topology: tpu7x:2x2x1
jax: 0.10.0
libtpu: 0.0.40
codegen_flags: <defaults>
</compile_context>

<pallas_src>
import functools
import math

import jax
import jax.numpy as jnp
from jax.experimental import pallas as pl
from jax.experimental.pallas import tpu as pltpu

HIDDEN = 128


def dqn_kernel(x_ref, w1_ref, b1_ref, a1_ref,
               w2_ref, b2_ref, a2_ref,
               w3_ref, b3_ref, o_ref):
    x = x_ref[...]                       # (tb, n_obs) f32
    w1 = w1_ref[...]                     # (n_obs, 128) f32
    n_obs = w1_ref.shape[0]

    # layer1 as n_obs broadcast FMAs on the VPU (K is tiny -> skip the MXU).
    # Static Python loop (n_obs = 3) unrolls at trace time.
    h1 = x[:, 0:1] * w1[0:1, :]
    for k in range(1, n_obs):
        h1 = h1 + x[:, k:k + 1] * w1[k:k + 1, :]
    h1 = h1 + b1_ref[...]
    # PReLU (per-channel alpha broadcast over batch), f32 on the VPU.
    h1 = jnp.where(h1 > 0, h1, a1_ref[...] * h1)

    # layer2 + PReLU: bf16 MXU operands, f32 accumulation, f32 elementwise.
    h2 = jnp.dot(h1.astype(jnp.bfloat16), w2_ref[...],
                 preferred_element_type=jnp.float32) + b2_ref[...]
    h2 = jnp.where(h2 > 0, h2, a2_ref[...] * h2)

    # output layer: narrow (tb, n_actions) store.
    o_ref[...] = jnp.dot(h2.astype(jnp.bfloat16), w3_ref[...],
                         preferred_element_type=jnp.float32) + b3_ref[...]


def _round_up(x, m):
    return (x + m - 1) // m * m


@functools.partial(jax.jit, static_argnums=(2,))
def dqn_forward(x, padded_params, tile_b=512):
    """x: (B, n_observations) float32 -> (B, n_actions) float32.

    `padded_params` must come from prepare_params().  The batch is tiled into
    tb-row blocks; weights use constant index_maps so they stay resident in
    VMEM across grid steps.
    """
    w1, b1, a1, w2, b2, a2, w3, b3 = padded_params
    B, n_obs = x.shape
    n_actions = w3.shape[1]

    # Sublane-aligned batch tile.  When the batch is large enough, cap the
    # tile at ~half the batch so there are >=2 grid steps for the two v7x
    # TensorCores (no-op on v5e/v6e which have a single TC).
    B8 = _round_up(B, 8)
    tb = min(tile_b, B8)
    if B8 >= 256:
        tb = min(tb, _round_up(pl.cdiv(B8, 2), 8))
    B_pad = _round_up(B, tb)

    x = x.astype(jnp.float32)
    if B_pad != B:
        # Batch-only zero pad (padded rows are sliced off below).
        x = jnp.pad(x, ((0, B_pad - B), (0, 0)))

    in_batch_spec = pl.BlockSpec((tb, n_obs), lambda i: (i, 0))
    out_batch_spec = pl.BlockSpec((tb, n_actions), lambda i: (i, 0))
    resident = lambda a: pl.BlockSpec(a.shape, lambda i: tuple(0 for _ in a.shape))

    out = pl.pallas_call(
        dqn_kernel,
        out_shape=jax.ShapeDtypeStruct((B_pad, n_actions), jnp.float32),
        grid=(B_pad // tb,),
        in_specs=[
            in_batch_spec,
            resident(w1), resident(b1), resident(a1),
            resident(w2), resident(b2), resident(a2),
            resident(w3), resident(b3),
        ],
        out_specs=out_batch_spec,
        compiler_params=pltpu.CompilerParams(
            dimension_semantics=("parallel",)),
    )(x, w1, b1, a1, w2, b2, a2, w3, b3)

    if B_pad != B:
        out = out[:B]
    return out


def init_params(key, n_observations, n_actions, hidden=HIDDEN):
    """Deterministic init mimicking PyTorch nn.Linear default
    (U(-1/sqrt(fan_in), +1/sqrt(fan_in))) and nn.PReLU per-channel alpha in
    [0.1, 0.5].  Weights stored as (in, out) == transposed PyTorch weight."""
    ks = jax.random.split(key, 8)

    def linear(kw, kb, fan_in, fan_out):
        bound = 1.0 / math.sqrt(fan_in)
        w = jax.random.uniform(kw, (fan_in, fan_out), jnp.float32, -bound, bound)
        b = jax.random.uniform(kb, (1, fan_out), jnp.float32, -bound, bound)
        return w, b

    w1, b1 = linear(ks[0], ks[1], n_observations, hidden)
    w2, b2 = linear(ks[2], ks[3], hidden, hidden)
    w3, b3 = linear(ks[4], ks[5], hidden, n_actions)
    a1 = jax.random.uniform(ks[6], (1, hidden), jnp.float32, 0.1, 0.5)
    a2 = jax.random.uniform(ks[7], (1, hidden), jnp.float32, 0.1, 0.5)
    return (w1, b1, a1, w2, b2, a2, w3, b3)


def prepare_params(params):
    """One-time (outside the hot loop) parameter prep: cast the two 128-wide
    MXU weights to bf16 (halves weight DMA traffic, native-rate MXU on
    v5e/v6e/v7x).  w1 stays f32 (layer1 runs on the VPU; v5e has no bf16
    VPU), biases / PReLU alphas stay f32."""
    w1, b1, a1, w2, b2, a2, w3, b3 = params
    return (w1, b1, a1,
            w2.astype(jnp.bfloat16), b2, a2,
            w3.astype(jnp.bfloat16), b3)


def dqn_reference(x, params):
    """Pure-JAX f32 reference matching the PyTorch module."""
    w1, b1, a1, w2, b2, a2, w3, b3 = params
    h1 = x @ w1 + b1
    h1 = jnp.where(h1 > 0, h1, a1 * h1)
    h2 = h1 @ w2 + b2
    h2 = jnp.where(h2 > 0, h2, a2 * h2)
    return h2 @ w3 + b3


if __name__ == "__main__":
    # Pendulum-v1 observation is 3-dim; module hard-codes n_actions = 10.
    n_observations = 3
    n_actions = 10

    key = jax.random.PRNGKey(0)
    kx, kp, kx2 = jax.random.split(key, 3)

    params = init_params(kp, n_observations, n_actions)
    padded_params = prepare_params(params)   # prepared once, reused per call

    # bf16 MXU operands (f32 accumulation) -> loose-ish tolerance vs the
    # full-f32 reference.
    ATOL, RTOL = 5e-2, 5e-2

    # Small single-tile batch.
    batch = 8
    x = jax.random.normal(kx, (batch, n_observations), dtype=jnp.float32)
    out = jax.block_until_ready(dqn_forward(x, padded_params, 512))
    ref = dqn_reference(x, params)
    assert out.shape == (batch, n_actions)
    assert jnp.allclose(out, ref, atol=ATOL, rtol=RTOL)

    # Larger batch exercising the batch grid: B=300 -> tb=152, B_pad=304,
    # 2 parallel grid steps (both v7x TensorCores busy) + batch padding path.
    batch2 = 300
    x2 = jax.random.normal(kx2, (batch2, n_observations), dtype=jnp.float32)
    out2 = jax.block_until_ready(dqn_forward(x2, padded_params, 512))
    ref2 = dqn_reference(x2, params)
    assert out2.shape == (batch2, n_actions)
    assert jnp.allclose(out2, ref2, atol=ATOL, rtol=RTOL)

    print("KERNEL_OK")
</pallas_src>

<mosaic_0001>
module attributes {stable_mosaic.version = 11 : i64} {
  func.func @dqn_kernel(%arg0: i32, %arg1: memref<8x3xf32, #tpu.memory_space<vmem>>, %arg2: memref<3x128xf32, #tpu.memory_space<vmem>>, %arg3: memref<1x128xf32, #tpu.memory_space<vmem>>, %arg4: memref<1x128xf32, #tpu.memory_space<vmem>>, %arg5: memref<128x128xbf16, #tpu.memory_space<vmem>>, %arg6: memref<1x128xf32, #tpu.memory_space<vmem>>, %arg7: memref<1x128xf32, #tpu.memory_space<vmem>>, %arg8: memref<128x10xbf16, #tpu.memory_space<vmem>>, %arg9: memref<1x10xf32, #tpu.memory_space<vmem>>, %arg10: memref<8x10xf32, #tpu.memory_space<vmem>>) attributes {dimension_semantics = [#tpu.dimension_semantics<parallel>], iteration_bounds = array<i64: 1>, scalar_prefetch = 0 : i64, scratch_operands = 0 : i64, tpu.core_type = #tpu.core_type<tc>, window_params = [{transform_indices = @transform_0, window_bounds = array<i64: 8, 3>}, {pipeline_mode = #tpu.pipeline_mode<synchronous>, transform_indices = @transform_1, window_bounds = array<i64: 3, 128>}, {pipeline_mode = #tpu.pipeline_mode<synchronous>, transform_indices = @transform_2, window_bounds = array<i64: 1, 128>}, {pipeline_mode = #tpu.pipeline_mode<synchronous>, transform_indices = @transform_3, window_bounds = array<i64: 1, 128>}, {pipeline_mode = #tpu.pipeline_mode<synchronous>, transform_indices = @transform_4, window_bounds = array<i64: 128, 128>}, {pipeline_mode = #tpu.pipeline_mode<synchronous>, transform_indices = @transform_5, window_bounds = array<i64: 1, 128>}, {pipeline_mode = #tpu.pipeline_mode<synchronous>, transform_indices = @transform_6, window_bounds = array<i64: 1, 128>}, {pipeline_mode = #tpu.pipeline_mode<synchronous>, transform_indices = @transform_7, window_bounds = array<i64: 128, 10>}, {pipeline_mode = #tpu.pipeline_mode<synchronous>, transform_indices = @transform_8, window_bounds = array<i64: 1, 10>}, {transform_indices = @transform_9, window_bounds = array<i64: 8, 10>}]} {
    %c0 = arith.constant 0 : index
    %c0_0 = arith.constant 0 : index
    %0 = vector.load %arg1[%c0, %c0_0] : memref<8x3xf32, #tpu.memory_space<vmem>>, vector<8x3xf32>
    %c0_1 = arith.constant 0 : index
    %c0_2 = arith.constant 0 : index
    %1 = vector.load %arg2[%c0_1, %c0_2] : memref<3x128xf32, #tpu.memory_space<vmem>>, vector<3x128xf32>
    %2 = vector.extract_strided_slice %0 {offsets = [0, 0], sizes = [8, 1], strides = [1, 1]} : vector<8x3xf32> to vector<8x1xf32>
    %3 = vector.extract_strided_slice %1 {offsets = [0, 0], sizes = [1, 128], strides = [1, 1]} : vector<3x128xf32> to vector<1x128xf32>
    %4 = vector.broadcast %2 : vector<8x1xf32> to vector<8x128xf32>
    %5 = vector.broadcast %3 : vector<1x128xf32> to vector<8x128xf32>
    %6 = arith.mulf %4, %5 : vector<8x128xf32>
    %7 = vector.extract_strided_slice %0 {offsets = [0, 1], sizes = [8, 1], strides = [1, 1]} : vector<8x3xf32> to vector<8x1xf32>
    %8 = vector.extract_strided_slice %1 {offsets = [1, 0], sizes = [1, 128], strides = [1, 1]} : vector<3x128xf32> to vector<1x128xf32>
    %9 = vector.broadcast %7 : vector<8x1xf32> to vector<8x128xf32>
    %10 = vector.broadcast %8 : vector<1x128xf32> to vector<8x128xf32>
    %11 = arith.mulf %9, %10 : vector<8x128xf32>
    %12 = arith.addf %6, %11 : vector<8x128xf32>
    %13 = vector.extract_strided_slice %0 {offsets = [0, 2], sizes = [8, 1], strides = [1, 1]} : vector<8x3xf32> to vector<8x1xf32>
    %14 = vector.extract_strided_slice %1 {offsets = [2, 0], sizes = [1, 128], strides = [1, 1]} : vector<3x128xf32> to vector<1x128xf32>
    %15 = vector.broadcast %13 : vector<8x1xf32> to vector<8x128xf32>
    %16 = vector.broadcast %14 : vector<1x128xf32> to vector<8x128xf32>
    %17 = arith.mulf %15, %16 : vector<8x128xf32>
    %18 = arith.addf %12, %17 : vector<8x128xf32>
    %c0_3 = arith.constant 0 : index
    %c0_4 = arith.constant 0 : index
    %19 = vector.load %arg3[%c0_3, %c0_4] : memref<1x128xf32, #tpu.memory_space<vmem>>, vector<1x128xf32>
    %20 = vector.broadcast %19 : vector<1x128xf32> to vector<8x128xf32>
    %21 = arith.addf %18, %20 : vector<8x128xf32>
    %cst = arith.constant 0.000000e+00 : f32
    %22 = vector.broadcast %cst : f32 to vector<8x128xf32>
    %23 = arith.cmpf ogt, %21, %22 : vector<8x128xf32>
    %c0_5 = arith.constant 0 : index
    %c0_6 = arith.constant 0 : index
    %24 = vector.load %arg4[%c0_5, %c0_6] : memref<1x128xf32, #tpu.memory_space<vmem>>, vector<1x128xf32>
    %25 = vector.broadcast %24 : vector<1x128xf32> to vector<8x128xf32>
    %26 = arith.mulf %25, %21 : vector<8x128xf32>
    %27 = arith.select %23, %21, %26 : vector<8x128xi1>, vector<8x128xf32>
    %28 = arith.truncf %27 : vector<8x128xf32> to vector<8x128xbf16>
    %c0_7 = arith.constant 0 : index
    %c0_8 = arith.constant 0 : index
    %29 = vector.load %arg5[%c0_7, %c0_8] : memref<128x128xbf16, #tpu.memory_space<vmem>>, vector<128x128xbf16>
    %cst_9 = arith.constant dense<0.000000e+00> : vector<8x128xf32>
    %30 = tpu.matmul %28, %29, %cst_9 {dimension_numbers = #tpu.dot_dimension_numbers<[1], [0], [0], [1], [0, 0, 1, 1], [], []>} : vector<8x128xbf16>, vector<128x128xbf16>, vector<8x128xf32> -> vector<8x128xf32>
    %c0_10 = arith.constant 0 : index
    %c0_11 = arith.constant 0 : index
    %31 = vector.load %arg6[%c0_10, %c0_11] : memref<1x128xf32, #tpu.memory_space<vmem>>, vector<1x128xf32>
    %32 = vector.broadcast %31 : vector<1x128xf32> to vector<8x128xf32>
    %33 = arith.addf %30, %32 : vector<8x128xf32>
    %cst_12 = arith.constant 0.000000e+00 : f32
    %34 = vector.broadcast %cst_12 : f32 to vector<8x128xf32>
    %35 = arith.cmpf ogt, %33, %34 : vector<8x128xf32>
    %c0_13 = arith.constant 0 : index
    %c0_14 = arith.constant 0 : index
    %36 = vector.load %arg7[%c0_13, %c0_14] : memref<1x128xf32, #tpu.memory_space<vmem>>, vector<1x128xf32>
    %37 = vector.broadcast %36 : vector<1x128xf32> to vector<8x128xf32>
    %38 = arith.mulf %37, %33 : vector<8x128xf32>
    %39 = arith.select %35, %33, %38 : vector<8x128xi1>, vector<8x128xf32>
    %40 = arith.truncf %39 : vector<8x128xf32> to vector<8x128xbf16>
    %c0_15 = arith.constant 0 : index
    %c0_16 = arith.constant 0 : index
    %41 = vector.load %arg8[%c0_15, %c0_16] : memref<128x10xbf16, #tpu.memory_space<vmem>>, vector<128x10xbf16>
    %cst_17 = arith.constant dense<0.000000e+00> : vector<8x10xf32>
    %42 = tpu.matmul %40, %41, %cst_17 {dimension_numbers = #tpu.dot_dimension_numbers<[1], [0], [0], [1], [0, 0, 1, 1], [], []>} : vector<8x128xbf16>, vector<128x10xbf16>, vector<8x10xf32> -> vector<8x10xf32>
    %c0_18 = arith.constant 0 : index
    %c0_19 = arith.constant 0 : index
    %43 = vector.load %arg9[%c0_18, %c0_19] : memref<1x10xf32, #tpu.memory_space<vmem>>, vector<1x10xf32>
    %44 = vector.broadcast %43 : vector<1x10xf32> to vector<8x10xf32>
    %45 = arith.addf %42, %44 : vector<8x10xf32>
    %c0_20 = arith.constant 0 : index
    %c0_21 = arith.constant 0 : index
    %46 = vector.load %arg10[%c0_20, %c0_21] : memref<8x10xf32, #tpu.memory_space<vmem>>, vector<8x10xf32>
    tpu.vector_store %arg10[%c0_20, %c0_21], %45 {strides = array<i32>} : memref<8x10xf32, #tpu.memory_space<vmem>>, vector<8x10xf32>,
    return
  }
  func.func @transform_0(%arg0: i32) -> (i32, i32) {
    %c0_i32 = arith.constant 0 : i32
    %c0_i32_0 = arith.constant 0 : i32
    return %arg0, %c0_i32 : i32, i32
  }
  func.func @transform_1(%arg0: i32) -> (i32, i32) {
    %c0_i32 = arith.constant 0 : i32
    %c0_i32_0 = arith.constant 0 : i32
    %c0_i32_1 = arith.constant 0 : i32
    return %c0_i32, %c0_i32_0 : i32, i32
  }
  func.func @transform_2(%arg0: i32) -> (i32, i32) {
    %c0_i32 = arith.constant 0 : i32
    %c0_i32_0 = arith.constant 0 : i32
    %c0_i32_1 = arith.constant 0 : i32
    return %c0_i32, %c0_i32_0 : i32, i32
  }
  func.func @transform_3(%arg0: i32) -> (i32, i32) {
    %c0_i32 = arith.constant 0 : i32
    %c0_i32_0 = arith.constant 0 : i32
    %c0_i32_1 = arith.constant 0 : i32
    return %c0_i32, %c0_i32_0 : i32, i32
  }
  func.func @transform_4(%arg0: i32) -> (i32, i32) {
    %c0_i32 = arith.constant 0 : i32
    %c0_i32_0 = arith.constant 0 : i32
    %c0_i32_1 = arith.constant 0 : i32
    return %c0_i32, %c0_i32_0 : i32, i32
  }
  func.func @transform_5(%arg0: i32) -> (i32, i32) {
    %c0_i32 = arith.constant 0 : i32
    %c0_i32_0 = arith.constant 0 : i32
    %c0_i32_1 = arith.constant 0 : i32
    return %c0_i32, %c0_i32_0 : i32, i32
  }
  func.func @transform_6(%arg0: i32) -> (i32, i32) {
    %c0_i32 = arith.constant 0 : i32
    %c0_i32_0 = arith.constant 0 : i32
    %c0_i32_1 = arith.constant 0 : i32
    return %c0_i32, %c0_i32_0 : i32, i32
  }
  func.func @transform_7(%arg0: i32) -> (i32, i32) {
    %c0_i32 = arith.constant 0 : i32
    %c0_i32_0 = arith.constant 0 : i32
    %c0_i32_1 = arith.constant 0 : i32
    return %c0_i32, %c0_i32_0 : i32, i32
  }
  func.func @transform_8(%arg0: i32) -> (i32, i32) {
    %c0_i32 = arith.constant 0 : i32
    %c0_i32_0 = arith.constant 0 : i32
    %c0_i32_1 = arith.constant 0 : i32
    return %c0_i32, %c0_i32_0 : i32, i32
  }
  func.func @transform_9(%arg0: i32) -> (i32, i32) {
    %c0_i32 = arith.constant 0 : i32
    %c0_i32_0 = arith.constant 0 : i32
    return %arg0, %c0_i32 : i32, i32
  }
}

</mosaic_0001>

<bundles_post_ra>
// kernel: dqn_forward.1
= control target key start
LH: loop header
LB: loop body
LE: loop exit
PB: predicated region body
PF: predicated region fallthrough
CT: control target
= control target key end

     0   :  { %v463_v2 = vmov 0   ;;  %v464_v3 = vmov 2   ;;  %v465_v4 = vmov 0.0   ;;  %v466_v6 = vmov 1   ;;  %s618_s0 = inlined_call_operand.vmem [shape: f32[8,3], index: 0, kind: input, shape index: {}]   ;;  %s619_s1 = inlined_call_operand.vmem [shape: f32[3,128], index: 1, kind: input, shape index: {}]   ;;  %s620_s2 = inlined_call_operand.vmem [shape: f32[1,128], index: 2, kind: input, shape index: {}]   ;;  %s621_s3 = inlined_call_operand.vmem [shape: f32[1,128], index: 3, kind: input, shape index: {}]   ;;  %s622_s4 = inlined_call_operand.vmem [shape: bf16[128,128], index: 4, kind: input, shape index: {}]   ;;  %s623_s5 = inlined_call_operand.vmem [shape: f32[1,128], index: 5, kind: input, shape index: {}]   ;;  %s624_s6 = inlined_call_operand.vmem [shape: f32[1,128], index: 6, kind: input, shape index: {}]   ;;  %s625_s7 = inlined_call_operand.vmem [shape: bf16[128,10], index: 7, kind: input, shape index: {}]   ;;  %s626_s8 = inlined_call_operand.vmem [shape: f32[1,10], index: 8, kind: input, shape index: {}]   ;;  %s627_s9 = inlined_call_operand.hbm [shape: f32[8,10], index: 9, kind: output, shape index: {}]  }
   0x1   :  { %v34_v0 = vld [vmem:[%s618_s0] sm:$0xff]  ;;  %419 = vset.pattern.permute.xlu0 %v463_v2  ;;  %421 = vset.pattern.permute.xlu1 %v464_v3  ;;  %v424_v5 = vld [vmem:[%s622_s4 + $0x8] sm:$0xff]   ;;  %v425_v7 = vld [vmem:[%s622_s4 + $0x10] sm:$0xff]   ;;  %vm467_vm0 = vmmov 0  }
   0x2   :  { %v423_v1 = vld [vmem:[%s622_s4] sm:$0xff]   ;;  %38 = vperm.xlu0 %419, %v34_v0   ;;  %57 = vperm.xlu1 %421, %v34_v0   ;;  %v426_v8 = vld [vmem:[%s622_s4 + $0x18] sm:$0xff]  }
   0x3   :  { %373 = vmatprep.subr.bf16.mxu0 %v465_v4  ;;  %393 = vmatprep.subr.bf16.mxu1 %v465_v4 }
   0x4   :  { %374 = vmatpush3.bf16.msra.mxu0 %v423_v1  ;;  %389 = vmatprep.mubr.msk.bf16.mxu0 %vm467_vm0, %v465_v4 }
   0x5   :  { %375 = vmatprep.subr.bf16.mxu0 %v465_v4  ;;  %409 = vmatprep.mubr.msk.bf16.mxu1 %vm467_vm0, %v465_v4 }
   0x6   :  { %420 = vset.pattern.permute.xlu0 %v466_v6 }
   0x7   :  { %47 = vperm.xlu0 %420, %v34_v0  }
   0x8   :  { %376 = vmatpush3.bf16.msra.mxu0 %v424_v5 }
   0x9   :  { %377 = vmatprep.subr.bf16.mxu0 %v465_v4 }
   0xb   :  { %422 = vset.pattern.permute.xlu0 %v464_v3 }
   0xc   :  { %378 = vmatpush3.bf16.msra.mxu0 %v425_v7 }
   0xd   :  { %379 = vmatprep.subr.bf16.mxu0 %v465_v4 }
   0xe   :  { %14 = vsyncpa [#allocation3], 0  ;;  %v427_v9 = vld [vmem:[%s622_s4 + $0x20] sm:$0xff]   ;;  %v428_v10 = vld [vmem:[%s622_s4 + $0x28] sm:$0xff]   ;;  %v41_v19 = vlaneseq  ;;  %s468_s27 = smov [#allocation2]   ;;  %vm318_vm3 = vcmask 80896  }
   0xf   :  { %v431_v11 = vld [vmem:[%s625_s7] sm:$0xff]   ;;  %v432_v12 = vld [vmem:[%s625_s7 + $0x8] sm:$0xff]   ;;  %v429_v13 = vld [vmem:[%s622_s4 + $0x30] sm:$0xff]  }
  0x10   :  { %380 = vmatpush3.bf16.msra.mxu0 %v426_v8  ;;  %394 = vmatpush3.bf16.msra.mxu1 %v431_v11  ;;  %v433_v14 = vld [vmem:[%s625_s7 + $0x10] sm:$0xff]   ;;  %v430_v15 = vld [vmem:[%s622_s4 + $0x38] sm:$0xff]   ;;  %v435_v17 = vld [vmem:[%s625_s7 + $0x20] sm:$0xff]   ;;  %v42_v20 = vshrl.u32 %v41_v19, 7 }
  0x11   :  { %381 = vmatprep.subr.bf16.mxu0 %v465_v4  ;;  %395 = vmatprep.subr.bf16.mxu1 %v465_v4  ;;  %v434_v16 = vld [vmem:[%s625_s7 + $0x18] sm:$0xff]   ;;  %v436_v18 = vld [vmem:[%s625_s7 + $0x28] sm:$0xff]   ;;  %v35_v24 = vld [vmem:[%s619_s1] sm:$0x7] }
  0x12   :  { %v43_v21 = vsub.s32 0, %v42_v20  ;;  %v52_v22 = vsub.s32 1, %v42_v20  ;;  %v62_v23 = vsub.s32 2, %v42_v20  ;;  %v334_v35 = vld [vmem:[%s620_s2] ss:$0 sm:$0xff]  ;;  %v437_v42 = vld [vmem:[%s625_s7 + $0x30] sm:$0xff]  }
  0x13   :  { %v335_v37 = vld [vmem:[%s621_s3] ss:$0 sm:$0xff]  ;;  %v438_v43 = vld [vmem:[%s625_s7 + $0x38] sm:$0xff]  }
  0x14   :  { %382 = vmatpush3.bf16.msra.mxu0 %v427_v9  ;;  %396 = vmatpush3.bf16.msra.mxu1 %v432_v12  ;;  %v44_v26 = vrot.slane %v35_v24, %v43_v21  ;;  %v53_v27 = vrot.slane %v35_v24, %v52_v22  ;;  %v63_v28 = vrot.slane %v35_v24, %v62_v23  ;;  %v336_v44 = vld [vmem:[%s623_s5] ss:$0 sm:$0xff]  ;;  %s326_s5 = sshll.u32 %s468_s27, 4  ;;  %s327_s5 = int_to_ptr.vmem [resolvable:$true] %s326_s5 }
  0x15   :  { %383 = vmatprep.subr.bf16.mxu0 %v465_v4  ;;  %397 = vmatprep.subr.bf16.mxu1 %v465_v4  ;;  %v345_v46 = vld [vmem:[%s624_s6] ss:$0 sm:$0xff]  ;;  %s439_s6 = scalar_lea.vmem %s327_s5, 128  ;;  %p444_p1 = scmp.lt.s32.totalorder %s327_s5, %s327_s5 }
  0x16   :  { %v346_v54 = vld [vmem:[%s626_s8] ss:$0 sm:$0xff]  ;;  %p440_p0 = scmp.ne.s32.totalorder %s327_s5, %s439_s6  ;;  %p445_p2 = scmp.lt.s32.totalorder %s439_s6, %s439_s6 }
  0x18   :  { %384 = vmatpush3.bf16.msra.mxu0 %v428_v10  ;;  %398 = vmatpush3.bf16.msra.mxu1 %v433_v14  ;;  %p446_p3 = por %p445_p2, %p444_p1 }
  0x19   :  { %385 = vmatprep.subr.bf16.mxu0 %v465_v4  ;;  %399 = vmatprep.subr.bf16.mxu1 %v465_v4 }
  0x1a   :  { %p447_p4 = pnand %p446_p3, %p440_p0 }
  0x1c   :  { %386 = vmatpush3.bf16.msra.mxu0 %v429_v13  ;;  %400 = vmatpush3.bf16.msra.mxu1 %v434_v16 }
  0x1d   :  { %387 = vmatprep.subr.bf16.mxu0 %v465_v4  ;;  %401 = vmatprep.subr.bf16.mxu1 %v465_v4 }
  0x20   :  { %388 = vmatpush3.bf16.msra.mxu0 %v430_v15  ;;  %402 = vmatpush3.bf16.msra.mxu1 %v435_v17 }
  0x21   :  { %403 = vmatprep.subr.bf16.mxu1 %v465_v4 }
  0x24   :  { %404 = vmatpush3.bf16.msra.mxu1 %v436_v18 }
  0x25   :  { %405 = vmatprep.subr.bf16.mxu1 %v465_v4 }
  0x28   :  { %406 = vmatpush3.bf16.msra.mxu1 %v437_v42 }
  0x29   :  { %407 = vmatprep.subr.bf16.mxu1 %v465_v4 }
  0x2c   :  { %408 = vmatpush3.bf16.msra.mxu1 %v438_v43 }
  0x81   :  { %v39_v25 = vpop.permute.xlu0 %38  ;;  %v58_v29 = vpop.permute.xlu1 %57 }
  0x82   :  { %v45_v31 = vmul.f32 %v44_v26, %v39_v25  ;;  %v64_v33 = vmul.f32 %v63_v28, %v58_v29 }
  0x86   :  { %v48_v30 = vpop.permute.xlu0 %47 }
  0x87   :  { %v54_v32 = vmul.f32 %v53_v27, %v48_v30 }
  0x89   :  { %v55_v34 = vadd.f32 %v54_v32, %v45_v31 }
  0x8b   :  { %v65_v36 = vadd.f32 %v64_v33, %v55_v34 }
  0x8d   :  { %v73_v38 = vadd.f32 %v334_v35, %v65_v36 }
  0x8f   :  { %vm74_vm1 = vcmp.gt.f32.partialorder %v73_v38, 0.0  ;;  %v82_v39 = vmul.f32 %v335_v37, %v73_v38 }
  0x91   :  { %v83_v40 = vsel %vm74_vm1, %v73_v38, %v82_v39 }
  0x92   :  { %v84_v41 = vpack.c.bf16 %v83_v40, %v83_v40 }
  0x94   :  { %390 = vmatmul.mubr.bf16.vlgmr.msra.gmra.mrb[0].mxu0 %v84_v41 }
 0x167   :  { %v190_v45 = vpop.f32.mrb[0].mxu0 }
 0x168   :  { %v191_v47 = vadd.f32 %v336_v44, %v190_v45  ;;  %v391_v48 = vpop.f32.mrb[1].mxu0 }
 0x169   :  { %v193_v49 = vpop.f32.mrb[2].mxu0 }
 0x16a   :  { %vm196_vm2 = vcmp.gt.f32.partialorder %v191_v47, 0.0  ;;  %v204_v50 = vmul.f32 %v345_v46, %v191_v47  ;;  %v392_v51 = vpop.f32.mrb[3].mxu0 }
 0x16c   :  { %v205_v52 = vsel %vm196_vm2, %v191_v47, %v204_v50 }
 0x16d   :  { %v206_v53 = vpack.c.bf16 %v205_v52, %v205_v52 }
 0x16f   :  { %410 = vmatmul.mubr.bf16.vlgmr.msra.gmra.mrb[0].mxu1 %v206_v53 }
 0x242   :  { %v312_v55 = vpop.f32.mrb[0].mxu1 }
 0x243   :  { %v313_v56 = vadd.f32 %v346_v54, %v312_v55  ;;  %v411_v57 = vpop.f32.mrb[1].mxu1 }
 0x244   :  { %v315_v58 = vpop.f32.mrb[2].mxu1 }
 0x245   :  { %v412_v59 = vpop.f32.mrb[3].mxu1  ;;  %319 = vst.msk [vmem:[#allocation2] sm:$0xff] %vm318_vm3, %v313_v56 }
 0x246   :  { %450 = shalt.err (!%p447_p4)
}
 0x247   :  { %s451_s8 = scalar_lea.hbm %s627_s9, 128 }
 0x248   :  { %p452_p5 = scmp.ne.s32.totalorder %s627_s9, %s451_s8  ;;  %p455_p6 = scmp.lt.u32.totalorder %s451_s8, %s627_s9 }
 0x24a   :  { %p457_p7 = pnand %p455_p6, %p452_p5 }
 0x24c   :  { %460 = shalt.err (!%p457_p7)
}
 0x24d   :  { %329 = dma.vmem_to_hbm [thread:$0]  %s327_s5, 128, %s627_s9, [#allocation3]  }
 0x24e   :  { %461 = dma.done.wait [#allocation3], 128  }
 0x24f   :  { %462 = vsyncadd [#allocation3], 4294967168 }
 0x250   :  { %333 = vsyncpa [#allocation3], 1 }

</bundles_post_ra>
